<compile_context>
chip_gen: v5e
topology: v5e:2x2
jax: 0.10.0
libtpu: 0.0.40
codegen_flags: <defaults>
</compile_context>

<pallas_src>
import jax
import jax.numpy as jnp
from jax import lax
from jax.experimental import pallas as pl
from jax.experimental.pallas import tpu as pltpu

# ----------------------- configuration (small demo sizes) -----------------------
N  = 2        # batch
CH = 3        # Chans
S  = 128      # Samples
K1 = 15       # kernLength (must be odd)
F1 = 8
D  = 2
F2 = F1 * D   # 16
K3 = 29       # SeparableConv1d kernel size (hardcoded in the module)
P1 = K1 // 2
P3 = K3 // 2
NC = 4        # nb_classes

KE = K1 + CH - 1          # 17 : effective kernel width of the fused conv1∘conv2
S2 = S - CH + 1           # 126: length after conv2 (valid conv, kernel = Chans)
L1 = S2 // 4              # 31 : length after AvgPool1d(4)
L2 = L1 // 8              # 3  : length after AvgPool1d(8)
FC_IN = F2 * L2           # 48 : actual flatten size fed to fc
ZW = L1 + K3 - 1          # 59 : zero-padded pooled width for the depthwise conv
TAP_CHUNK = 8             # depthwise taps contracted per accumulating MXU matmul

# column layout of the single packed row-constant matrix (F2 rows), segments 128-aligned
OFF_W12 = 0                       # fused conv1+bn1+conv2(+bn2 scale) weights (F2, KE*CH)
OFF_WDP = 128                     # fused depthwise*pointwise(+bn3 scale)     (F2, K3*F2)
OFF_WFC = OFF_WDP + 512           # 640: fc weights, permuted                  (NC, FC_IN)
OFF_SML = OFF_WFC + FC_IN         # 688: t2b | b3 | bfc | eye(NC)
CPACK_W = OFF_SML + 3 + NC        # 695

assert K1 % 2 == 1
assert KE * CH <= OFF_WDP
assert K3 * F2 <= OFF_WFC - OFF_WDP
assert L1 * 4 <= S2 and L2 * 8 <= L1
assert K3 - 1 + L1 <= ZW


# ------------------------------- Pallas kernel ----------------------------------
def eegnet_kernel(xim_ref, cp_ref, pp_ref, out_ref):
    f32 = jnp.float32
    xim = xim_ref[0]                                               # (KE*CH, S2)

    # ---- conv1 + bn1 + conv2 + bn2 (host-fused) : ONE MXU matmul (K = 51) + relu ----
    w12 = cp_ref[:, OFF_W12:OFF_W12 + KE * CH]                     # static ref slice
    t2b = cp_ref[:, OFF_SML + 0:OFF_SML + 1]
    y2 = jnp.maximum(jnp.dot(w12, xim, preferred_element_type=f32) + t2b, 0.0)   # (F2, S2)

    # ---- AvgPool1d(4) as a matmul, fused with the zero-pad placement at lane P3 ----
    z = jnp.dot(y2, pp_ref[:, 0:ZW], preferred_element_type=f32)                 # (F2, ZW)
    # dropout: identity (inference)

    # ---- SeparableConv1d: depthwise (x) pointwise (x) bn3-scale fused on host ----
    # Accumulating MXU matmuls over the sublane im2col of lane-shifted z slices,
    # consumed in chunks of <= TAP_CHUNK taps (K = 128,128,128,80) on L1 valid lanes.
    acc = None
    for c0 in range(0, K3, TAP_CHUNK):
        c1 = min(c0 + TAP_CHUNK, K3)
        zim = jnp.concatenate([z[:, k:k + L1] for k in range(c0, c1)], axis=0)   # ((c1-c0)*F2, L1)
        wchunk = cp_ref[:, OFF_WDP + c0 * F2:OFF_WDP + c1 * F2]                  # 128-aligned
        part = jnp.dot(wchunk, zim, preferred_element_type=f32)                  # (F2, L1)
        acc = part if acc is None else acc + part
    b3 = cp_ref[:, OFF_SML + 1:OFF_SML + 2]
    y3 = jnp.maximum(acc + b3, 0.0)                                              # (F2, L1)

    # ---- AvgPool1d(8) as a matmul; zero rows of p8 drop t >= L2*8 ----
    y4 = jnp.dot(y3, pp_ref[0:L1, ZW:ZW + L2], preferred_element_type=f32)       # (F2, L2)
    # dropout: identity (inference)

    # ---- flatten + fc as a single MXU matvec (weights pre-permuted on host) ----
    y4c = jnp.concatenate([y4[:, l:l + 1] for l in range(L2)], axis=0)           # (FC_IN, 1)
    wfc = cp_ref[0:NC, OFF_WFC:OFF_WFC + FC_IN]
    bfc = cp_ref[0:NC, OFF_SML + 2:OFF_SML + 3]
    logits = jnp.dot(wfc, y4c, preferred_element_type=f32) + bfc                 # (NC, 1)

    # ---- lane-dense store: NC sublane values -> NC lanes via identity-mul + sublane
    # reduction (no in-kernel transpose / relayout) ----
    eye = cp_ref[0:NC, OFF_SML + 3:OFF_SML + 3 + NC]                             # (NC, NC)
    out_ref[...] = jnp.sum(logits * eye, axis=0, keepdims=True)[None]            # (1, 1, NC)


# --------------------------------- wrapper ---------------------------------------
def eegnet_forward(x, kparams):
    cpack, ppack = kparams

    # host-side glue: zero-pad + im2col for the fused conv1∘conv2 (row order m*CH + c),
    # (KE*CH, S2) = (51, 126) per batch element (~25 KB).
    xp = jnp.pad(x, ((0, 0), (0, 0), (P1, P1)))                              # (N, CH, S+2*P1)
    xim = jnp.concatenate([xp[:, :, m:m + S2] for m in range(KE)], axis=1)   # (N, KE*CH, S2)

    grid_spec = pltpu.PrefetchScalarGridSpec(
        num_scalar_prefetch=0,
        grid=(N,),
        in_specs=[
            pl.BlockSpec((1, KE * CH, S2), lambda b: (b, 0, 0)),
            pl.BlockSpec(cpack.shape, lambda b: (0, 0)),
            pl.BlockSpec(ppack.shape, lambda b: (0, 0)),
        ],
        out_specs=pl.BlockSpec((1, 1, NC), lambda b: (b, 0, 0)),
    )
    # grid=(N,) + "parallel": on v7x the two batch elements map onto the two TensorCores.
    # On single-TC v5e/v6e the grid could be collapsed to one step with the batch stacked
    # along lanes (saves ~0.35 us/step + one writeback); not done here to keep the v7x
    # two-core mapping.
    out = pl.pallas_call(
        eegnet_kernel,
        out_shape=jax.ShapeDtypeStruct((N, 1, NC), jnp.float32),
        grid_spec=grid_spec,
        compiler_params=pltpu.CompilerParams(dimension_semantics=("parallel",)),
    )(xim, cpack, ppack)
    return out[:, 0, :]


# --------------------------- parameters (deterministic) ---------------------------
def init_params(key):
    ks = jax.random.split(key, 21)
    f32 = jnp.float32

    def nrm(k, shape, scale):
        return (scale * jax.random.normal(k, shape)).astype(f32)

    w1  = nrm(ks[0], (F1, CH, K1), (CH * K1) ** -0.5)   # conv1.weight
    b1  = nrm(ks[1], (F1,), 0.1)                        # conv1.bias
    w2  = nrm(ks[2], (F2, 1, CH), CH ** -0.5)           # conv2.weight (groups=F1)
    b2  = nrm(ks[3], (F2,), 0.1)                        # conv2.bias
    wd  = nrm(ks[4], (F2, 1, K3), K3 ** -0.5)           # conv3 depthwise weight
    wp  = nrm(ks[5], (F2, F2, 1), F2 ** -0.5)           # conv3 pointwise weight
    bp  = nrm(ks[6], (F2,), 0.1)                        # conv3 pointwise bias
    wfc = nrm(ks[7], (NC, FC_IN), FC_IN ** -0.5)        # fc.weight (actual flatten size)
    bfc = nrm(ks[8], (NC,), 0.1)                        # fc.bias

    def bn(k0, k1_, k2, k3, c):
        gamma = 1.0 + 0.1 * jax.random.normal(k0, (c,))
        beta  = 0.1 * jax.random.normal(k1_, (c,))
        mean  = 0.1 * jax.random.normal(k2, (c,))
        var   = 1.0 + 0.1 * jnp.abs(jax.random.normal(k3, (c,)))
        scale = (gamma / jnp.sqrt(var + 1e-5)).astype(f32)
        shift = (beta - mean * scale).astype(f32)
        return scale, shift

    s1, t1 = bn(ks[9],  ks[10], ks[11], ks[12], F1)
    s2, t2 = bn(ks[13], ks[14], ks[15], ks[16], F2)
    s3, t3 = bn(ks[17], ks[18], ks[19], ks[20], F2)

    pt_params = (w1, b1, s1, t1, w2, b2, s2, t2, wd, wp, bp, s3, t3, wfc, bfc)

    # -------- kernel-layout parameters (host-side fusion / packing) --------
    group = jnp.arange(F2) // D

    # conv1 (pad K1//2) ∘ bn1 ∘ conv2 (grouped, valid) ∘ bn2-scale fused into ONE
    # (F2, KE*CH) matrix over the im2col of the padded input; column index m*CH + c.
    w1s  = w1 * s1[:, None, None]                              # bn1 scale into conv1
    w1sg = w1s[group]                                          # (F2, CH, K1) per out-chan
    wfull = jnp.zeros((F2, CH, KE), f32)
    for j in range(CH):
        wfull = wfull.at[:, :, j:j + K1].add(w2[:, 0, j][:, None, None] * w1sg)
    w12 = jnp.transpose(wfull, (0, 2, 1)).reshape(F2, KE * CH)
    b12 = b2 + w2[:, 0, :].sum(axis=1) * (s1[group] * b1[group] + t1[group])
    w12s = w12 * s2[:, None]                                   # bn2 scale into weights
    t2b  = t2 + s2 * b12                                       # bn2 shift + propagated biases

    # depthwise ⊗ pointwise ⊗ bn3-scale fused: Wdp[f, k*F2+g] = s3[f]*wp[f,g]*wd[g,k]
    wp2  = wp[:, :, 0]                                         # (F2, F2)
    wdm  = wd[:, 0, :]                                         # (F2, K3)
    wdps = (wp2[:, None, :] * jnp.transpose(wdm)[None, :, :]).reshape(F2, K3 * F2)
    wdps = wdps * s3[:, None]
    b3   = bp * s3 + t3

    # fc weight permuted so columns match y4 stacked column-wise along sublanes:
    # wfccat[c, l*F2 + f] = wfc[c, f*L2 + l]
    wfccat = jnp.transpose(wfc.reshape(NC, F2, L2), (0, 2, 1)).reshape(NC, L2 * F2)

    # AvgPool1d(4) fused with placement at lane offset P3 (zero padding for conv3)
    u = jnp.arange(S2)
    c = jnp.arange(ZW)
    p4z = jnp.where((u[:, None] < L1 * 4) & (c[None, :] == P3 + u[:, None] // 4),
                    0.25, 0.0).astype(f32)                     # (S2, ZW)

    # AvgPool1d(8); zero rows discard t >= L2*8
    t = jnp.arange(L1)
    l = jnp.arange(L2)
    p8 = jnp.where((t[:, None] < L2 * 8) & (l[None, :] == t[:, None] // 8),
                   0.125, 0.0).astype(f32)                     # (L1, L2)

    # pack ALL row-type constants into one (F2, CPACK_W) matrix (one constant DMA);
    # segments start at 128-aligned lane offsets so in-kernel ref slices stay aligned.
    def pad_to(mat, rows, cols):
        out = jnp.zeros((rows, cols), f32)
        return out.at[:mat.shape[0], :mat.shape[1]].set(mat)

    def colv(v):
        out = jnp.zeros((F2, 1), f32)
        return out.at[:v.shape[0], 0].set(v)

    cpack = jnp.concatenate([
        pad_to(w12s,   F2, OFF_WDP - OFF_W12),
        pad_to(wdps,   F2, OFF_WFC - OFF_WDP),
        pad_to(wfccat, F2, FC_IN),
        colv(t2b), colv(b3), colv(bfc),
        pad_to(jnp.eye(NC, dtype=f32), F2, NC),
    ], axis=1)                                                 # (F2, CPACK_W)
    assert cpack.shape == (F2, CPACK_W)

    # both pooling matrices in one constant (second DMA)
    ppack = jnp.concatenate([p4z, pad_to(p8, S2, L2)], axis=1) # (S2, ZW + L2)

    return pt_params, (cpack, ppack)


# -------------------------- pure-JAX reference (for checking) ---------------------
def reference(x, pt):
    (w1, b1, s1, t1, w2, b2, s2, t2, wd, wp, bp, s3, t3, wfc, bfc) = pt
    dn = ('NCH', 'OIH', 'NCH')
    hp = lax.Precision.HIGHEST
    y = lax.conv_general_dilated(x, w1, (1,), [(P1, P1)], dimension_numbers=dn,
                                 precision=hp) + b1[None, :, None]
    y = y * s1[None, :, None] + t1[None, :, None]
    y = lax.conv_general_dilated(y, w2, (1,), [(0, 0)], dimension_numbers=dn,
                                 feature_group_count=F1, precision=hp) + b2[None, :, None]
    y = jnp.maximum(y * s2[None, :, None] + t2[None, :, None], 0.0)
    y = y[:, :, :L1 * 4].reshape(N, F2, L1, 4).mean(-1)
    y = lax.conv_general_dilated(y, wd, (1,), [(P3, P3)], dimension_numbers=dn,
                                 feature_group_count=F2, precision=hp)
    y = lax.conv_general_dilated(y, wp, (1,), [(0, 0)], dimension_numbers=dn,
                                 precision=hp) + bp[None, :, None]
    y = jnp.maximum(y * s3[None, :, None] + t3[None, :, None], 0.0)
    y = y[:, :, :L2 * 8].reshape(N, F2, L2, 8).mean(-1)
    y = y.reshape(N, FC_IN)
    return jnp.dot(y, wfc.T, precision=hp) + bfc[None, :]


if __name__ == "__main__":
    key = jax.random.PRNGKey(0)
    kx, kp = jax.random.split(key)
    x = jax.random.normal(kx, (N, CH, S), jnp.float32)

    pt_params, kparams = init_params(kp)

    out = eegnet_forward(x, kparams)
    out = jax.block_until_ready(out)

    ref = reference(x, pt_params)
    assert out.shape == (N, NC)
    assert jnp.allclose(out, ref, atol=2e-2, rtol=2e-2), (out, ref)
    print("KERNEL_OK")
</pallas_src>

<mosaic_0001>
module attributes {stable_mosaic.version = 11 : i64} {
  func.func @eegnet_kernel(%arg0: i32, %arg1: memref<1x51x126xf32, #tpu.memory_space<vmem>>, %arg2: memref<16x695xf32, #tpu.memory_space<vmem>>, %arg3: memref<126x62xf32, #tpu.memory_space<vmem>>, %arg4: memref<1x1x4xf32, #tpu.memory_space<vmem>>) attributes {dimension_semantics = [#tpu.dimension_semantics<parallel>], iteration_bounds = array<i64: 2>, scalar_prefetch = 0 : i64, scratch_operands = 0 : i64, tpu.core_type = #tpu.core_type<tc>, window_params = [{transform_indices = @transform_0, window_bounds = array<i64: 1, 51, 126>}, {pipeline_mode = #tpu.pipeline_mode<synchronous>, transform_indices = @transform_1, window_bounds = array<i64: 16, 695>}, {pipeline_mode = #tpu.pipeline_mode<synchronous>, transform_indices = @transform_2, window_bounds = array<i64: 126, 62>}, {transform_indices = @transform_3, window_bounds = array<i64: 1, 1, 4>}]} {
    %c0 = arith.constant 0 : index
    %c0_0 = arith.constant 0 : index
    %c0_1 = arith.constant 0 : index
    %0 = vector.load %arg1[%c0, %c0_0, %c0_1] : memref<1x51x126xf32, #tpu.memory_space<vmem>>, vector<1x51x126xf32>
    %1 = vector.shape_cast %0 : vector<1x51x126xf32> to vector<51x126xf32>
    %c0_2 = arith.constant 0 : index
    %c0_3 = arith.constant 0 : index
    %2 = vector.load %arg2[%c0_2, %c0_3] : memref<16x695xf32, #tpu.memory_space<vmem>>, vector<16x51xf32>
    %c0_4 = arith.constant 0 : index
    %c688 = arith.constant 688 : index
    %3 = vector.load %arg2[%c0_4, %c688] : memref<16x695xf32, #tpu.memory_space<vmem>>, vector<16x1xf32>
    %cst = arith.constant dense<0.000000e+00> : vector<16x126xf32>
    %4 = tpu.matmul %2, %1, %cst {dimension_numbers = #tpu.dot_dimension_numbers<[1], [0], [0], [1], [0, 0, 1, 1], [], []>} : vector<16x51xf32>, vector<51x126xf32>, vector<16x126xf32> -> vector<16x126xf32>
    %5 = vector.broadcast %3 : vector<16x1xf32> to vector<16x126xf32>
    %6 = arith.addf %4, %5 : vector<16x126xf32>
    %cst_5 = arith.constant 0.000000e+00 : f32
    %7 = vector.broadcast %cst_5 : f32 to vector<16x126xf32>
    %8 = arith.maximumf %6, %7 : vector<16x126xf32>
    %c0_6 = arith.constant 0 : index
    %c0_7 = arith.constant 0 : index
    %9 = vector.load %arg3[%c0_6, %c0_7] : memref<126x62xf32, #tpu.memory_space<vmem>>, vector<126x59xf32>
    %cst_8 = arith.constant dense<0.000000e+00> : vector<16x59xf32>
    %10 = tpu.matmul %8, %9, %cst_8 {dimension_numbers = #tpu.dot_dimension_numbers<[1], [0], [0], [1], [0, 0, 1, 1], [], []>} : vector<16x126xf32>, vector<126x59xf32>, vector<16x59xf32> -> vector<16x59xf32>
    %11 = vector.extract_strided_slice %10 {offsets = [0, 0], sizes = [16, 31], strides = [1, 1]} : vector<16x59xf32> to vector<16x31xf32>
    %12 = vector.extract_strided_slice %10 {offsets = [0, 1], sizes = [16, 31], strides = [1, 1]} : vector<16x59xf32> to vector<16x31xf32>
    %13 = vector.extract_strided_slice %10 {offsets = [0, 2], sizes = [16, 31], strides = [1, 1]} : vector<16x59xf32> to vector<16x31xf32>
    %14 = vector.extract_strided_slice %10 {offsets = [0, 3], sizes = [16, 31], strides = [1, 1]} : vector<16x59xf32> to vector<16x31xf32>
    %15 = vector.extract_strided_slice %10 {offsets = [0, 4], sizes = [16, 31], strides = [1, 1]} : vector<16x59xf32> to vector<16x31xf32>
    %16 = vector.extract_strided_slice %10 {offsets = [0, 5], sizes = [16, 31], strides = [1, 1]} : vector<16x59xf32> to vector<16x31xf32>
    %17 = vector.extract_strided_slice %10 {offsets = [0, 6], sizes = [16, 31], strides = [1, 1]} : vector<16x59xf32> to vector<16x31xf32>
    %18 = vector.extract_strided_slice %10 {offsets = [0, 7], sizes = [16, 31], strides = [1, 1]} : vector<16x59xf32> to vector<16x31xf32>
    %19 = tpu.concatenate %11, %12, %13, %14, %15, %16, %17, %18 in 0 : vector<16x31xf32>, vector<16x31xf32>, vector<16x31xf32>, vector<16x31xf32>, vector<16x31xf32>, vector<16x31xf32>, vector<16x31xf32>, vector<16x31xf32> -> vector<128x31xf32>
    %c0_9 = arith.constant 0 : index
    %c128 = arith.constant 128 : index
    %20 = vector.load %arg2[%c0_9, %c128] : memref<16x695xf32, #tpu.memory_space<vmem>>, vector<16x128xf32>
    %cst_10 = arith.constant dense<0.000000e+00> : vector<16x31xf32>
    %21 = tpu.matmul %20, %19, %cst_10 {dimension_numbers = #tpu.dot_dimension_numbers<[1], [0], [0], [1], [0, 0, 1, 1], [], []>} : vector<16x128xf32>, vector<128x31xf32>, vector<16x31xf32> -> vector<16x31xf32>
    %22 = vector.extract_strided_slice %10 {offsets = [0, 8], sizes = [16, 31], strides = [1, 1]} : vector<16x59xf32> to vector<16x31xf32>
    %23 = vector.extract_strided_slice %10 {offsets = [0, 9], sizes = [16, 31], strides = [1, 1]} : vector<16x59xf32> to vector<16x31xf32>
    %24 = vector.extract_strided_slice %10 {offsets = [0, 10], sizes = [16, 31], strides = [1, 1]} : vector<16x59xf32> to vector<16x31xf32>
    %25 = vector.extract_strided_slice %10 {offsets = [0, 11], sizes = [16, 31], strides = [1, 1]} : vector<16x59xf32> to vector<16x31xf32>
    %26 = vector.extract_strided_slice %10 {offsets = [0, 12], sizes = [16, 31], strides = [1, 1]} : vector<16x59xf32> to vector<16x31xf32>
    %27 = vector.extract_strided_slice %10 {offsets = [0, 13], sizes = [16, 31], strides = [1, 1]} : vector<16x59xf32> to vector<16x31xf32>
    %28 = vector.extract_strided_slice %10 {offsets = [0, 14], sizes = [16, 31], strides = [1, 1]} : vector<16x59xf32> to vector<16x31xf32>
    %29 = vector.extract_strided_slice %10 {offsets = [0, 15], sizes = [16, 31], strides = [1, 1]} : vector<16x59xf32> to vector<16x31xf32>
    %30 = tpu.concatenate %22, %23, %24, %25, %26, %27, %28, %29 in 0 : vector<16x31xf32>, vector<16x31xf32>, vector<16x31xf32>, vector<16x31xf32>, vector<16x31xf32>, vector<16x31xf32>, vector<16x31xf32>, vector<16x31xf32> -> vector<128x31xf32>
    %c0_11 = arith.constant 0 : index
    %c256 = arith.constant 256 : index
    %31 = vector.load %arg2[%c0_11, %c256] : memref<16x695xf32, #tpu.memory_space<vmem>>, vector<16x128xf32>
    %cst_12 = arith.constant dense<0.000000e+00> : vector<16x31xf32>
    %32 = tpu.matmul %31, %30, %cst_12 {dimension_numbers = #tpu.dot_dimension_numbers<[1], [0], [0], [1], [0, 0, 1, 1], [], []>} : vector<16x128xf32>, vector<128x31xf32>, vector<16x31xf32> -> vector<16x31xf32>
    %33 = arith.addf %21, %32 : vector<16x31xf32>
    %34 = vector.extract_strided_slice %10 {offsets = [0, 16], sizes = [16, 31], strides = [1, 1]} : vector<16x59xf32> to vector<16x31xf32>
    %35 = vector.extract_strided_slice %10 {offsets = [0, 17], sizes = [16, 31], strides = [1, 1]} : vector<16x59xf32> to vector<16x31xf32>
    %36 = vector.extract_strided_slice %10 {offsets = [0, 18], sizes = [16, 31], strides = [1, 1]} : vector<16x59xf32> to vector<16x31xf32>
    %37 = vector.extract_strided_slice %10 {offsets = [0, 19], sizes = [16, 31], strides = [1, 1]} : vector<16x59xf32> to vector<16x31xf32>
    %38 = vector.extract_strided_slice %10 {offsets = [0, 20], sizes = [16, 31], strides = [1, 1]} : vector<16x59xf32> to vector<16x31xf32>
    %39 = vector.extract_strided_slice %10 {offsets = [0, 21], sizes = [16, 31], strides = [1, 1]} : vector<16x59xf32> to vector<16x31xf32>
    %40 = vector.extract_strided_slice %10 {offsets = [0, 22], sizes = [16, 31], strides = [1, 1]} : vector<16x59xf32> to vector<16x31xf32>
    %41 = vector.extract_strided_slice %10 {offsets = [0, 23], sizes = [16, 31], strides = [1, 1]} : vector<16x59xf32> to vector<16x31xf32>
    %42 = tpu.concatenate %34, %35, %36, %37, %38, %39, %40, %41 in 0 : vector<16x31xf32>, vector<16x31xf32>, vector<16x31xf32>, vector<16x31xf32>, vector<16x31xf32>, vector<16x31xf32>, vector<16x31xf32>, vector<16x31xf32> -> vector<128x31xf32>
    %c0_13 = arith.constant 0 : index
    %c384 = arith.constant 384 : index
    %43 = vector.load %arg2[%c0_13, %c384] : memref<16x695xf32, #tpu.memory_space<vmem>>, vector<16x128xf32>
    %cst_14 = arith.constant dense<0.000000e+00> : vector<16x31xf32>
    %44 = tpu.matmul %43, %42, %cst_14 {dimension_numbers = #tpu.dot_dimension_numbers<[1], [0], [0], [1], [0, 0, 1, 1], [], []>} : vector<16x128xf32>, vector<128x31xf32>, vector<16x31xf32> -> vector<16x31xf32>
    %45 = arith.addf %33, %44 : vector<16x31xf32>
    %46 = vector.extract_strided_slice %10 {offsets = [0, 24], sizes = [16, 31], strides = [1, 1]} : vector<16x59xf32> to vector<16x31xf32>
    %47 = vector.extract_strided_slice %10 {offsets = [0, 25], sizes = [16, 31], strides = [1, 1]} : vector<16x59xf32> to vector<16x31xf32>
    %48 = vector.extract_strided_slice %10 {offsets = [0, 26], sizes = [16, 31], strides = [1, 1]} : vector<16x59xf32> to vector<16x31xf32>
    %49 = vector.extract_strided_slice %10 {offsets = [0, 27], sizes = [16, 31], strides = [1, 1]} : vector<16x59xf32> to vector<16x31xf32>
    %50 = vector.extract_strided_slice %10 {offsets = [0, 28], sizes = [16, 31], strides = [1, 1]} : vector<16x59xf32> to vector<16x31xf32>
    %51 = tpu.concatenate %46, %47, %48, %49, %50 in 0 : vector<16x31xf32>, vector<16x31xf32>, vector<16x31xf32>, vector<16x31xf32>, vector<16x31xf32> -> vector<80x31xf32>
    %c0_15 = arith.constant 0 : index
    %c512 = arith.constant 512 : index
    %52 = vector.load %arg2[%c0_15, %c512] : memref<16x695xf32, #tpu.memory_space<vmem>>, vector<16x80xf32>
    %cst_16 = arith.constant dense<0.000000e+00> : vector<16x31xf32>
    %53 = tpu.matmul %52, %51, %cst_16 {dimension_numbers = #tpu.dot_dimension_numbers<[1], [0], [0], [1], [0, 0, 1, 1], [], []>} : vector<16x80xf32>, vector<80x31xf32>, vector<16x31xf32> -> vector<16x31xf32>
    %54 = arith.addf %45, %53 : vector<16x31xf32>
    %c0_17 = arith.constant 0 : index
    %c689 = arith.constant 689 : index
    %55 = vector.load %arg2[%c0_17, %c689] : memref<16x695xf32, #tpu.memory_space<vmem>>, vector<16x1xf32>
    %56 = vector.broadcast %55 : vector<16x1xf32> to vector<16x31xf32>
    %57 = arith.addf %54, %56 : vector<16x31xf32>
    %cst_18 = arith.constant 0.000000e+00 : f32
    %58 = vector.broadcast %cst_18 : f32 to vector<16x31xf32>
    %59 = arith.maximumf %57, %58 : vector<16x31xf32>
    %c0_19 = arith.constant 0 : index
    %c59 = arith.constant 59 : index
    %60 = vector.load %arg3[%c0_19, %c59] : memref<126x62xf32, #tpu.memory_space<vmem>>, vector<31x3xf32>
    %cst_20 = arith.constant dense<0.000000e+00> : vector<16x3xf32>
    %61 = tpu.matmul %59, %60, %cst_20 {dimension_numbers = #tpu.dot_dimension_numbers<[1], [0], [0], [1], [0, 0, 1, 1], [], []>} : vector<16x31xf32>, vector<31x3xf32>, vector<16x3xf32> -> vector<16x3xf32>
    %62 = vector.extract_strided_slice %61 {offsets = [0, 0], sizes = [16, 1], strides = [1, 1]} : vector<16x3xf32> to vector<16x1xf32>
    %63 = vector.extract_strided_slice %61 {offsets = [0, 1], sizes = [16, 1], strides = [1, 1]} : vector<16x3xf32> to vector<16x1xf32>
    %64 = vector.extract_strided_slice %61 {offsets = [0, 2], sizes = [16, 1], strides = [1, 1]} : vector<16x3xf32> to vector<16x1xf32>
    %65 = tpu.concatenate %62, %63, %64 in 0 : vector<16x1xf32>, vector<16x1xf32>, vector<16x1xf32> -> vector<48x1xf32>
    %c0_21 = arith.constant 0 : index
    %c640 = arith.constant 640 : index
    %66 = vector.load %arg2[%c0_21, %c640] : memref<16x695xf32, #tpu.memory_space<vmem>>, vector<4x48xf32>
    %c0_22 = arith.constant 0 : index
    %c690 = arith.constant 690 : index
    %67 = vector.load %arg2[%c0_22, %c690] : memref<16x695xf32, #tpu.memory_space<vmem>>, vector<4x1xf32>
    %cst_23 = arith.constant dense<0.000000e+00> : vector<4x1xf32>
    %68 = tpu.matmul %66, %65, %cst_23 {dimension_numbers = #tpu.dot_dimension_numbers<[1], [0], [0], [1], [0, 0, 1, 1], [], []>} : vector<4x48xf32>, vector<48x1xf32>, vector<4x1xf32> -> vector<4x1xf32>
    %69 = arith.addf %68, %67 : vector<4x1xf32>
    %c0_24 = arith.constant 0 : index
    %c691 = arith.constant 691 : index
    %70 = vector.load %arg2[%c0_24, %c691] : memref<16x695xf32, #tpu.memory_space<vmem>>, vector<4x4xf32>
    %71 = vector.broadcast %69 : vector<4x1xf32> to vector<4x4xf32>
    %72 = arith.mulf %71, %70 : vector<4x4xf32>
    %cst_25 = arith.constant dense<0.000000e+00> : vector<4xf32>
    %73 = vector.multi_reduction <add>, %72, %cst_25 [0] : vector<4x4xf32> to vector<4xf32>
    %74 = vector.shape_cast %73 : vector<4xf32> to vector<1x4xf32>
    %75 = vector.shape_cast %74 : vector<1x4xf32> to vector<1x1x4xf32>
    %c0_26 = arith.constant 0 : index
    %c0_27 = arith.constant 0 : index
    %c0_28 = arith.constant 0 : index
    %76 = vector.load %arg4[%c0_26, %c0_27, %c0_28] : memref<1x1x4xf32, #tpu.memory_space<vmem>>, vector<1x1x4xf32>
    tpu.vector_store %arg4[%c0_26, %c0_27, %c0_28], %75 {strides = array<i32>} : memref<1x1x4xf32, #tpu.memory_space<vmem>>, vector<1x1x4xf32>,
    return
  }
  func.func @transform_0(%arg0: i32) -> (i32, i32, i32) {
    %c0_i32 = arith.constant 0 : i32
    %c0_i32_0 = arith.constant 0 : i32
    %c0_i32_1 = arith.constant 0 : i32
    return %arg0, %c0_i32, %c0_i32_0 : i32, i32, i32
  }
  func.func @transform_1(%arg0: i32) -> (i32, i32) {
    %c0_i32 = arith.constant 0 : i32
    %c0_i32_0 = arith.constant 0 : i32
    %c0_i32_1 = arith.constant 0 : i32
    return %c0_i32, %c0_i32_0 : i32, i32
  }
  func.func @transform_2(%arg0: i32) -> (i32, i32) {
    %c0_i32 = arith.constant 0 : i32
    %c0_i32_0 = arith.constant 0 : i32
    %c0_i32_1 = arith.constant 0 : i32
    return %c0_i32, %c0_i32_0 : i32, i32
  }
  func.func @transform_3(%arg0: i32) -> (i32, i32, i32) {
    %c0_i32 = arith.constant 0 : i32
    %c0_i32_0 = arith.constant 0 : i32
    %c0_i32_1 = arith.constant 0 : i32
    return %arg0, %c0_i32, %c0_i32_0 : i32, i32, i32
  }
}

</mosaic_0001>

<bundles_post_ra>
// kernel: tpu_custom_call.1
= control target key start
LH: loop header
LB: loop body
LE: loop exit
PB: predicated region body
PF: predicated region fallthrough
CT: control target
= control target key end

     0   :  { %8 = vsyncpa [#allocation3], 0  ;;  %s1324_s0 = inlined_call_operand.vmem [shape: f32[2,51,126], index: 0, kind: input, shape index: {}]   ;;  %s1325_s1 = inlined_call_operand.vmem [shape: f32[16,695], index: 1, kind: input, shape index: {}]   ;;  %s1326_s2 = inlined_call_operand.vmem [shape: f32[126,62], index: 2, kind: input, shape index: {}]   ;;  %s1327_s3 = inlined_call_operand.hbm [shape: f32[2,1,4], index: 3, kind: output, shape index: {}]  }
   0x1   :  { %10 = vsyncpa [#allocation3 + $0x1], 0  ;;  %s1085_s12 = smov 0   ;;  %s1087_s13 = smov 0  }
   0x2   :  { %s1089_s14 = smov 0   ;;  %s1091_s15 = smov 0  }
   0x3 LB: > { %s1106_s16 = sadd.s32 4294967295, %s1047_s15   ;;  %s750_s17 = sadd.s32 4294967294, %s1047_s15   ;;  %s1047_s15 = sphi %s1091_s15, %s1333_s15   ;;  %s1043_s14 = sphi %s1089_s14, %s1332_s14   ;;  %s1039_s13 = sphi %s1087_s13, %s1331_s13   ;;  %s1035_s12 = sphi %s1085_s12, %s1330_s12  }
   0x4   : > { %s1110_s18 = sadd.s32 1, %s1047_s15   ;;  %s91_s19 = sadd.s32 1, %s1043_s14 }
   0x5   : > { %s88_s20 = ssub.s32 %s1047_s15, %s1110_s18  ;;  %p101_p0 = scmp.ne.s32.totalorder %s1043_s14, %s1039_s13 }
   0x6   : > { %p89_p1 = scmp.eq.s32.totalorder %s88_s20, 0  ;;  %p102_p2 = scmp.eq.s32.totalorder %s1106_s16, 1 }
   0x7   : > { %p107_p3 = scmp.ne.s32.totalorder %s1039_s13, %s1035_s12  ;;  %p108_p4 = scmp.eq.s32.totalorder %s750_s17, 1 }
   0x8   : > { %s1121_s21 = scalar_select %p89_p1, %s1043_s14, %s91_s19  }
   0x9   : > { %p1123_p5 = por %p102_p2, %p101_p0  ;;  %p1127_p6 = por %p108_p4, %p107_p3 }
   0xa   : > { %p753_p7 = scmp.ge.s32.totalorder %s1047_s15, 1  ;;  %p140_p8 = scmp.lt.s32.totalorder %s1047_s15, 3 }
   0xc   : > { %p141_p9 = pnand %p753_p7, %p140_p8 }
   0xd   : > { %p163_p10 = scmp.lt.s32.totalorder (!%p141_p9), %s1106_s16, 1  ;;  %s1051_s7 = smov (!%p141_p9), 123  }
   0xe   : > { %144 = sbr.rel (%p141_p9) target bundleno = 1355 (0x54b), region = 32  ;;  %s1052_s8 = smov (!%p141_p9), 121  }
   0xf   : > { %s1053_s9 = smov (!%p141_p9), 124   ;;  %s1054_s10 = smov (!%p141_p9), 122  }
  0x10   : > { %s1055_s17 = smov (!%p141_p9), 127   ;;  %s1057_s19 = smov (!%p141_p9), 120  }
  0x11   : > { %s1058_s20 = smov (!%p141_p9), 112   ;;  %s1059_s24 = smov (!%p141_p9), 104  }
  0x12   : > { %s1060_s4 = smov (!%p141_p9), 69   ;;  %s1062_s30 = smov (!%p141_p9), 78  }
  0x13   : > { %v1137_v0 = vld [vmem:[%s1325_s1 + $0x28] sm:$0xff]  ;;  %v1049_v1 = vmov 48   ;;  %v240_v2 = vld [vmem:[%s1326_s2 + $0x78] sm:$0x3f]  ;;  %vm248_vm0 = vcmask 1045504   ;;  %s164_s28 = scalar_select %p163_p10, %s1106_s16, 1 }
  0x14   : > { %825 = vset.pattern.permute.xlu0 %v1049_v1  ;;  %758 = vmatpush.msk.msra.mxu1 %vm248_vm0, %v240_v2  ;;  %v239_v3 = vld [vmem:[%s1326_s2 + $0x70] sm:$0xff]  ;;  %v238_v4 = vld [vmem:[%s1326_s2 + $0x68] sm:$0xff]  ;;  %vm196_vm1 = vcmask 1042432   ;;  %v237_v5 = vld [vmem:[%s1326_s2 + $0x60] sm:$0xff]  ;;  %vm189_vm2 = vcmask 416768   ;;  %vm241_vm3 = vcmask 1031168  }
  0x15   : > { %181 = vperm.xlu0 %825, %v1137_v0   ;;  %s769_s6 = smul.u32 56, %s164_s28  ;;  %v1159_v8 = vld [vmem:[%s1325_s1 + $0x58] sm:$0xff]  ;;  %v235_v11 = vld [vmem:[%s1326_s2 + $0x50] sm:$0xff]  ;;  %v234_v13 = vld [vmem:[%s1326_s2 + $0x48] sm:$0xff]  ;;  %vm524_vm4 = vcmask 654336   ;;  %vm594_vm5 = vcmask 1046528  }
  0x16   : > { %253 = vmatpush.msra.mxu1 %v239_v3  ;;  %v236_v9 = vld [vmem:[%s1326_s2 + $0x58] sm:$0xff]  ;;  %v233_v15 = vld [vmem:[%s1326_s2 + $0x40] sm:$0xff]  ;;  %v231_v20 = vld [vmem:[%s1326_s2 + $0x30] sm:$0xff]  ;;  %vm587_vm6 = vcmask 252928   ;;  %vm639_vm7 = vcmask 392192   ;;  %vm668_vm8 = vcmask 445848  }
  0x17   : > { %s167_s11 = scalar_lea.vmem %s1324_s0, %s769_s6  ;;  %v232_v17 = vld [vmem:[%s1326_s2 + $0x38] sm:$0xff]  ;;  %v175_v19 = vld [vmem:[%s1325_s1] sm:$0xff]  ;;  %v176_v21 = vld [vmem:[%s1325_s1 + $0x30] sm:$0xff]  ;;  %s1050_s6 = smov 125   ;;  %vm680_vm9 = vcmask 24576  }
  0x18   : > { %254 = vmatpush.msra.mxu1 %v238_v4  ;;  %v174_v6 = vld [vmem:[%s167_s11 + $0x30] sm:$0x7]  ;;  %v173_v7 = vld [vmem:[%s167_s11 + $0x28] sm:$0xff]  ;;  %v172_v10 = vld [vmem:[%s167_s11 + $0x20] sm:$0xff] }
  0x19   : > { %755 = vmatpush.msk.msra.mxu0 %vm196_vm1, %v174_v6  ;;  %v171_v12 = vld [vmem:[%s167_s11 + $0x18] sm:$0xff]  ;;  %v170_v14 = vld [vmem:[%s167_s11 + $0x10] sm:$0xff]  ;;  %v169_v16 = vld [vmem:[%s167_s11 + $0x8] sm:$0xff] }
  0x1a   : > { %255 = vmatpush.msra.mxu1 %v237_v5  ;;  %v168_v18 = vld [vmem:[%s167_s11] sm:$0xff]  ;;  %v230_v22 = vld [vmem:[%s1326_s2 + $0x28] sm:$0xff]  ;;  %v228_v24 = vld [vmem:[%s1326_s2 + $0x18] sm:$0xff]  ;;  %s1056_s11 = smov 126  }
  0x1b   : > { %210 = vmatpush.msra.mxu0 %v173_v7  ;;  %v229_v23 = vld [vmem:[%s1326_s2 + $0x20] sm:$0xff]  ;;  %v1198_v25 = vld [vmem:[%s1326_s2 + $0x10] sm:$0xff]  ;;  %v1204_v26 = vld [vmem:[%s1326_s2 + $0x8] sm:$0xff] }
  0x1c   : > { %256 = vmatpush.msra.mxu1 %v236_v9  ;;  %v1210_v27 = vld [vmem:[%s1326_s2] sm:$0xff] }
  0x1d   : > { %186 = vperm.xlu0 %825, %v1159_v8   ;;  %211 = vmatpush.msra.mxu0 %v172_v10 }
  0x1e   : > { %257 = vmatpush.msra.mxu1 %v235_v11 }
  0x1f   : > { %212 = vmatpush.msra.mxu0 %v171_v12 }
  0x20   : > { %258 = vmatpush.msra.mxu1 %v234_v13 }
  0x21   : > { %213 = vmatpush.msra.mxu0 %v170_v14 }
  0x22   : > { %259 = vmatpush.msra.mxu1 %v233_v15 }
  0x23   : > { %214 = vmatpush.msra.mxu0 %v169_v16 }
  0x24   : > { %260 = vmatpush.msra.mxu1 %v232_v17 }
  0x25   : > { %215 = vmatpush.msra.mxu0 %v168_v18 }
  0x26   : > { %756 = vmatmul.msk.f32.vlgmr.msra.gmra.mxu0 %vm189_vm2, %v175_v19  ;;  %261 = vmatpush.msra.mxu1 %v231_v20  ;;  %v319_v20 = vld [vmem:[%s1325_s1 + $0x8] sm:$0xff] }
  0x28   : > { %262 = vmatpush.msra.mxu1 %v230_v22 }
  0x2a   : > { %263 = vmatpush.msra.mxu1 %v229_v23 }
  0x2c   : > { %264 = vmatpush.msra.mxu1 %v228_v24 }
  0x2e   : > { %757 = vmatmul.msk.f32.gmra.mxu0 %vm189_vm2, %v176_v21  ;;  %265 = vmatpush.msra.mxu1 %v1198_v25 }
  0x30   : > { %266 = vmatpush.msra.mxu1 %v1204_v26 }
  0x32   : > { %267 = vmatpush.msra.mxu1 %v1210_v27 }
  0x87   : > { %v182_v28 = vpop.permute.xlu0 %181 }
  0x8f   : > { %v187_v32 = vpop.permute.xlu0 %186 }
  0xa3   : > { %v217_v29 = vpop.f32.mrf.mxu0 }
  0xa4   : > { %v218_v30 = vadd.f32 %v217_v29, %v182_v28 }
  0xa6   : > { %v223_v31 = vmax.f32 %v218_v30, 0.0 }
  0xa8   : > { %759 = vmatmul.msk.f32.vlgmr.msra.gmra.mxu1 %vm241_vm3, %v223_v31 }
  0xab   : > { %v220_v33 = vpop.f32.mrf.mxu0 }
  0xac   : > { %v221_v34 = vadd.f32 %v220_v33, %v187_v32 }
  0xae   : > { %v224_v35 = vmax.f32 %v221_v34, 0.0  ;;  %v320_v34 = vld [vmem:[%s1325_s1 + $0x38] sm:$0xff] }
  0xb0   : > { %760 = vmatmul.msk.f32.gmra.mxu1 %vm241_vm3, %v224_v35  ;;  %v966_v35 = vpack.i.bf16 %v1204_v26, %v1198_v25 }
 0x125   : > { %v1213_v36 = vpop.f32.mrf.mxu1 }
 0x12d   : > { %v1215_v37 = vpop.f32.mrf.mxu1 }
 0x12e   : > { %v1219_v38 = vpack.i.bf16 %v1213_v36, %v1215_v37 }
 0x130   : > { %847 = vrot.lane.b32.xlu0 %v1219_v38, %s1050_s6  ;;  %837 = vrot.lane.b32.xlu2 %v1219_v38, %s1051_s7  ;;  %s691_s6 = scalar_lea.hbm %s1327_s3, %s1106_s16  ;;  %s1005_s16 = scalar_lea.hbm %s1327_s3, 2 }
 0x131   : > { %827 = vrot.lane.b32.xlu1 %v1219_v38, %s1052_s8 }
 0x138   : > { %842 = vrot.lane.b32.xlu2 %v1219_v38, %s1053_s9  ;;  %s695_s9 = sshll.u32 %s691_s6, 4  ;;  %s696_s9 = int_to_ptr.hbm [resolvable:$true] %s695_s9 }
 0x139   : > { %832 = vrot.lane.b32.xlu1 %v1219_v38, %s1054_s10 }
 0x140   : > { %857 = vrot.lane.b32.xlu2 %v1219_v38, %s1055_s17 }
 0x141   : > { %852 = vrot.lane.b32.xlu1 %v1219_v38, %s1056_s11 }
 0x148   : > { %862 = vrot.lane.b32.xlu2 %v1219_v38, %s1057_s19 }
 0x18a   : > { %v838_v39 = vpop.permute.xlu2 %837 }
 0x18b   : > { %v840_v40 = vunpack.i.h.bf16 %v838_v39  ;;  %v839_v41 = vunpack.i.l.bf16 %v838_v39  ;;  %877 = vrot.lane.b32.xlu2 %v838_v39, %s1057_s19 }
 0x192   : > { %v843_v48 = vpop.permute.xlu2 %842 }
 0x193   : > { %v845_v50 = vunpack.i.h.bf16 %v843_v48  ;;  %v844_v51 = vunpack.i.l.bf16 %v843_v48 }
 0x19a   : > { %v858_v57 = vpop.permute.xlu2 %857 }
 0x19b   : > { %v860_v58 = vunpack.i.h.bf16 %v858_v57  ;;  %v859_v59 = vunpack.i.l.bf16 %v858_v57 }
 0x1a2   : > { %v848_v49 = vpop.permute.xlu0 %847  ;;  %v1251_v60 = vpop.permute.xlu2 %862 }
 0x1a3   : > { %v828_v42 = vpop.permute.xlu1 %827  ;;  %v850_v52 = vunpack.i.h.bf16 %v848_v49  ;;  %v849_v53 = vunpack.i.l.bf16 %v848_v49  ;;  %v865_v25 = vunpack.i.h.bf16 %v1251_v60 }
 0x1a4   : > { %v830_v43 = vunpack.i.h.bf16 %v828_v42  ;;  %v829_v44 = vunpack.i.l.bf16 %v828_v42  ;;  %867 = vrot.lane.b32.xlu0 %v828_v42, %s1057_s19 }
 0x1a6   : > { %394 = vmatpush.msra.mxu3 %v829_v44  ;;  %v321_v44 = vld [vmem:[%s1325_s1 + $0x10] sm:$0xff] }
 0x1a8   : > { %395 = vmatpush.msra.mxu3 %v830_v43 }
 0x1ab   : > { %v833_v45 = vpop.permute.xlu1 %832 }
 0x1ac   : > { %v835_v46 = vunpack.i.h.bf16 %v833_v45  ;;  %v834_v47 = vunpack.i.l.bf16 %v833_v45  ;;  %892 = vrot.lane.b32.xlu2 %v833_v45, %s1058_s20  ;;  %872 = vrot.lane.b32.xlu1 %v833_v45, %s1057_s19 }
 0x1ad   : > { %882 = vrot.lane.b32.xlu0 %v828_v42, %s1058_s20 }
 0x1ae   : > { %396 = vmatpush.msra.mxu3 %v834_v47 }
 0x1b0   : > { %397 = vmatpush.msra.mxu3 %v835_v46  ;;  %v1061_v46 = vmov 49  }
 0x1b1   : > { %972 = vset.pattern.permute.xlu1 %v1061_v46  ;;  %971 = vset.pattern.permute.xlu2 %v1061_v46 }
 0x1b2   : > { %398 = vmatpush.msra.mxu3 %v839_v41  ;;  %v864_v41 = vunpack.i.l.bf16 %v1251_v60 }
 0x1b3   : > { %v853_v54 = vpop.permute.xlu1 %852 }
 0x1b4   : > { %v855_v55 = vunpack.i.h.bf16 %v853_v54  ;;  %v854_v56 = vunpack.i.l.bf16 %v853_v54  ;;  %399 = vmatpush.msra.mxu3 %v840_v40  ;;  %907 = vrot.lane.b32.xlu2 %v853_v54, %s1057_s19 }
 0x1b5   : > { %887 = vrot.lane.b32.xlu1 %v843_v48, %s1057_s19  ;;  %897 = vrot.lane.b32.xlu0 %v848_v49, %s1057_s19 }
 0x1b6   : > { %400 = vmatpush.msra.mxu3 %v844_v51 }
 0x1b8   : > { %401 = vmatpush.msra.mxu3 %v845_v50 }
 0x1ba   : > { %402 = vmatpush.msra.mxu3 %v849_v53  ;;  %v322_v53 = vld [vmem:[%s1325_s1 + $0x40] sm:$0xff] }
 0x1bc   : > { %403 = vmatpush.msra.mxu3 %v850_v52  ;;  %922 = vrot.lane.b32.xlu2 %v858_v57, %s1057_s19  ;;  %s999_s19 = sshra.s32 %s696_s9, 4  ;;  %s1000_s19 = int_to_ptr.hbm [resolvable:$true] %s999_s19 }
 0x1bd   : > { %902 = vrot.lane.b32.xlu1 %v838_v39, %s1058_s20  ;;  %912 = vrot.lane.b32.xlu0 %v843_v48, %s1058_s20  ;;  %p1006_p0 = scmp.lt.s32.totalorder %s1000_s19, %s1327_s3 }
 0x1be   : > { %404 = vmatpush.msra.mxu3 %v854_v56 }
 0x1c0   : > { %405 = vmatpush.msra.mxu3 %v855_v55 }
 0x1c2   : > { %406 = vmatpush.msra.mxu3 %v859_v59 }
 0x1c4   : > { %407 = vmatpush.msra.mxu3 %v860_v58  ;;  %947 = vrot.lane.b32.xlu2 %v858_v57, %s1058_s20 }
 0x1c5   : > { %917 = vrot.lane.b32.xlu1 %v843_v48, %s1059_s24  ;;  %927 = vrot.lane.b32.xlu0 %v848_v49, %s1058_s20 }
 0x1c6   : > { %408 = vmatpush.msra.mxu3 %v1215_v37 }
 0x1c8   : > { %409 = vmatpush.msra.mxu3 %v1213_v36  ;;  %v571_v36 = vld [vmem:[%s1326_s2 + $0x18] sm:$0x7f] }
 0x1c9   : > { %410 = vmatmul.f32.vlgmr.msra.gmra.mxu3 %v319_v20 }
 0x1cc   : > { %962 = vrot.lane.b32.xlu2 %v1219_v38, %s1059_s24 }
 0x1cd   : > { %932 = vrot.lane.b32.xlu1 %v848_v49, %s1059_s24  ;;  %937 = vrot.lane.b32.xlu0 %v853_v54, %s1058_s20 }
 0x1d1   : > { %413 = vmatmul.f32.gmra.mxu3 %v320_v34 }
 0x1d4   : > { %557 = vperm.xlu2 %971, %v1137_v0  }
 0x1d5   : > { %942 = vrot.lane.b32.xlu1 %v853_v54, %s1059_s24  ;;  %952 = vrot.lane.b32.xlu0 %v858_v57, %s1059_s24 }
 0x1dd   : > { %957 = vrot.lane.b32.xlu1 %v1219_v38, %s1058_s20  ;;  %582 = vrot.lane.b32.xlu0 %v571_v36, %s1060_s4  ;;  %s1001_s20 = scalar_lea.hbm %s1000_s19, 1 }
 0x1de   : > { %p1002_p11 = scmp.ne.s32.totalorder %s1000_s19, %s1001_s20  ;;  %p1007_p1 = scmp.lt.s32.totalorder %s1005_s16, %s1001_s20 }
 0x1e0   : > { %p1003_p12 = pnand %p1002_p11, %p1123_p5  ;;  %p1008_p2 = por %p1007_p1, %p1006_p0 }
 0x1e2   : > { %p1004_p13 = pneg %p1003_p12 }
 0x1e4   : > { %p1009_p3 = pnand %p1008_p2, %p1004_p13 }
 0x1e5   : > { %v878_v61 = vpop.permute.xlu2 %877  ;;  %967 = vrot.lane.b32.xlu1 %v966_v35, %s1060_s4  ;;  %576 = vrot.lane.b32.xlu0 %v1210_v27, %s1060_s4 }
 0x1e6   : > { %v879_v10 = vunpack.i.l.bf16 %v878_v61  ;;  %v880_v12 = vunpack.i.h.bf16 %v878_v61 }
 0x1ed   : > { %561 = vperm.xlu1 %972, %v1159_v8  }
 0x206   : > { %v893_v2 = vpop.permute.xlu2 %892 }
 0x207   : > { %v894_v11 = vunpack.i.l.bf16 %v893_v2  ;;  %v895_v15 = vunpack.i.h.bf16 %v893_v2 }
 0x20e   : > { %v908_v13 = vpop.permute.xlu2 %907 }
 0x20f   : > { %v909_v24 = vunpack.i.l.bf16 %v908_v13  ;;  %v910_v30 = vunpack.i.h.bf16 %v908_v13 }
 0x216   : > { %v868_v62 = vpop.permute.xlu0 %867  ;;  %v923_v29 = vpop.permute.xlu2 %922 }
 0x217   : > { %v869_v63 = vunpack.i.l.bf16 %v868_v62  ;;  %v870_v1 = vunpack.i.h.bf16 %v868_v62  ;;  %v924_v32 = vunpack.i.l.bf16 %v923_v29  ;;  %v925_v37 = vunpack.i.h.bf16 %v923_v29 }
 0x219   : > { %371 = vmatpush.msra.mxu2 %v869_v63 }
 0x21b   : > { %372 = vmatpush.msra.mxu2 %v870_v1 }
 0x21e   : > { %v873_v3 = vpop.permute.xlu1 %872  ;;  %v948_v51 = vpop.permute.xlu2 %947 }
 0x21f   : > { %v883_v4 = vpop.permute.xlu0 %882  ;;  %v874_v5 = vunpack.i.l.bf16 %v873_v3  ;;  %v875_v7 = vunpack.i.h.bf16 %v873_v3  ;;  %v949_v55 = vunpack.i.l.bf16 %v948_v51  ;;  %v950_v27 = vunpack.i.h.bf16 %v948_v51  ;;  %v417_v3 = vld [vmem:[%s1325_s1 + $0x18] sm:$0xff] }
 0x220   : > { %v884_v6 = vunpack.i.l.bf16 %v883_v4  ;;  %v885_v9 = vunpack.i.h.bf16 %v883_v4  ;;  %v492_v4 = vld [vmem:[%s1325_s1 + $0x20] sm:$0xff] }
 0x221   : > { %373 = vmatpush.msra.mxu2 %v874_v5  ;;  %v418_v5 = vld [vmem:[%s1325_s1 + $0x48] sm:$0xff] }
 0x222   : > { %467 = vmatpush.msrb.mxu0 %v884_v6  ;;  %v493_v6 = vld [vmem:[%s1325_s1 + $0x50] sm:$0xff] }
 0x223   : > { %374 = vmatpush.msra.mxu2 %v875_v7 }
 0x224   : > { %468 = vmatpush.msrb.mxu0 %v885_v9 }
 0x225   : > { %375 = vmatpush.msra.mxu2 %v879_v10 }
 0x226   : > { %469 = vmatpush.msrb.mxu0 %v894_v11  ;;  %v963_v59 = vpop.permute.xlu2 %962 }
 0x227   : > { %v888_v14 = vpop.permute.xlu1 %887  ;;  %v898_v16 = vpop.permute.xlu0 %897  ;;  %376 = vmatpush.msra.mxu2 %v880_v12  ;;  %v964_v63 = vunpack.i.l.bf16 %v963_v59  ;;  %v965_v2 = vunpack.i.h.bf16 %v963_v59 }
 0x228   : > { %v889_v17 = vunpack.i.l.bf16 %v888_v14  ;;  %470 = vmatpush.msrb.mxu0 %v895_v15  ;;  %v890_v18 = vunpack.i.h.bf16 %v888_v14  ;;  %v899_v19 = vunpack.i.l.bf16 %v898_v16  ;;  %v900_v21 = vunpack.i.h.bf16 %v898_v16 }
 0x22a   : > { %377 = vmatpush.msra.mxu2 %v889_v17 }
 0x22c   : > { %378 = vmatpush.msra.mxu2 %v890_v18 }
 0x22e   : > { %379 = vmatpush.msra.mxu2 %v899_v19  ;;  %v558_v19 = vpop.permute.xlu2 %557 }
 0x22f   : > { %v903_v22 = vpop.permute.xlu1 %902  ;;  %v913_v23 = vpop.permute.xlu0 %912 }
 0x230   : > { %380 = vmatpush.msra.mxu2 %v900_v21  ;;  %v904_v28 = vunpack.i.l.bf16 %v903_v22  ;;  %v905_v31 = vunpack.i.h.bf16 %v903_v22  ;;  %v914_v33 = vunpack.i.l.bf16 %v913_v23  ;;  %v915_v38 = vunpack.i.h.bf16 %v913_v23 }
 0x232   : > { %381 = vmatpush.msra.mxu2 %v909_v24  ;;  %471 = vmatpush.msrb.mxu0 %v904_v28 }
 0x234   : > { %382 = vmatpush.msra.mxu2 %v910_v30  ;;  %472 = vmatpush.msrb.mxu0 %v905_v31 }
 0x236   : > { %383 = vmatpush.msra.mxu2 %v924_v32  ;;  %473 = vmatpush.msrb.mxu0 %v914_v33 }
 0x237   : > { %v918_v39 = vpop.permute.xlu1 %917  ;;  %v928_v40 = vpop.permute.xlu0 %927 }
 0x238   : > { %384 = vmatpush.msra.mxu2 %v925_v37  ;;  %474 = vmatpush.msrb.mxu0 %v915_v38  ;;  %v919_v42 = vunpack.i.l.bf16 %v918_v39  ;;  %v929_v43 = vunpack.i.l.bf16 %v928_v40  ;;  %v920_v26 = vunpack.i.h.bf16 %v918_v39  ;;  %v930_v45 = vunpack.i.h.bf16 %v928_v40 }
 0x23a   : > { %385 = vmatpush.msra.mxu2 %v864_v41  ;;  %537 = vmatpush.msrb.mxu1 %v919_v42  ;;  %v634_v41 = vld [vmem:[%s1325_s1 + $0x28] sm:$0xf] }
 0x23b   : > { %475 = vmatpush.msrb.mxu0 %v929_v43  ;;  %636 = vrot.lane.b32.xlu1 %v634_v41, %s1062_s30 }
 0x23c   : > { %386 = vmatpush.msra.mxu2 %v865_v25  ;;  %538 = vmatpush.msrb.mxu1 %v920_v26 }
 0x23d   : > { %476 = vmatpush.msrb.mxu0 %v930_v45  ;;  %387 = vmatmul.f32.vlgmr.msra.gmra.mxu2 %v321_v44  ;;  %v1063_v44 = vmov 0  }
 0x23e   : > { %983 = vset.pattern.permute.xlu2 %v1063_v44  ;;  %984 = vset.pattern.permute.xlu0 %v1063_v44 }
 0x23f   : > { %v933_v47 = vpop.permute.xlu1 %932  ;;  %v938_v48 = vpop.permute.xlu0 %937 }
 0x240   : > { %v934_v49 = vunpack.i.l.bf16 %v933_v47  ;;  %v939_v50 = vunpack.i.l.bf16 %v938_v48  ;;  %v935_v52 = vunpack.i.h.bf16 %v933_v47  ;;  %v940_v54 = vunpack.i.h.bf16 %v938_v48 }
 0x242   : > { %539 = vmatpush.msrb.mxu1 %v934_v49  ;;  %477 = vmatpush.msrb.mxu0 %v939_v50 }
 0x244   : > { %540 = vmatpush.msrb.mxu1 %v935_v52  ;;  %478 = vmatpush.msrb.mxu0 %v940_v54 }
 0x245   : > { %390 = vmatmul.f32.gmra.mxu2 %v322_v53 }
 0x246   : > { %479 = vmatpush.msrb.mxu0 %v949_v55 }
 0x247   : > { %v943_v8 = vpop.permute.xlu1 %942  ;;  %v953_v57 = vpop.permute.xlu0 %952 }
 0x248   : > { %v944_v56 = vunpack.i.l.bf16 %v943_v8  ;;  %480 = vmatpush.msrb.mxu0 %v950_v27  ;;  %v945_v0 = vunpack.i.h.bf16 %v943_v8  ;;  %v954_v58 = vunpack.i.l.bf16 %v953_v57  ;;  %v955_v60 = vunpack.i.h.bf16 %v953_v57 }
 0x24a   : > { %541 = vmatpush.msrb.mxu1 %v944_v56 }
 0x24c   : > { %542 = vmatpush.msrb.mxu1 %v945_v0  ;;  %v411_v14 = vpop.f32.mrf.mxu3 }
 0x24e   : > { %543 = vmatpush.msrb.mxu1 %v954_v58 }
 0x24f   : > { %v958_v61 = vpop.permute.xlu1 %957  ;;  %v583_v9 = vpop.permute.xlu0 %582 }
 0x250   : > { %544 = vmatpush.msrb.mxu1 %v955_v60  ;;  %v959_v62 = vunpack.i.l.bf16 %v958_v61  ;;  %v960_v1 = vunpack.i.h.bf16 %v958_v61  ;;  %763 = vmatpush.msk.msrb.mxu2 %vm594_vm5, %v583_v9 }
 0x252   : > { %481 = vmatpush.msrb.mxu0 %v959_v62  ;;  %545 = vmatpush.msrb.mxu1 %v964_v63 }
 0x254   : > { %482 = vmatpush.msrb.mxu0 %v960_v1  ;;  %546 = vmatpush.msrb.mxu1 %v965_v2  ;;  %v414_v21 = vpop.f32.mrf.mxu3 }
 0x255   : > { %483 = vmatmul.f32.vlgmr.msrb.gmra.mxu0 %v417_v3  ;;  %761 = vmatmul.msk.f32.vlgmr.msrb.gmra.mxu1 %vm524_vm4, %v492_v4 }
 0x257   : > { %v968_v7 = vpop.permute.xlu1 %967  ;;  %v577_v12 = vpop.permute.xlu0 %576 }
 0x258   : > { %v969_v10 = vunpack.i.l.bf16 %v968_v7  ;;  %v970_v11 = vunpack.i.h.bf16 %v968_v7 }
 0x25a   : > { %610 = vmatpush.msrb.mxu2 %v969_v10 }
 0x25c   : > { %611 = vmatpush.msrb.mxu2 %v970_v11 }
 0x25d   : > { %486 = vmatmul.f32.gmra.mxu0 %v418_v5  ;;  %762 = vmatmul.msk.f32.gmra.mxu1 %vm524_vm4, %v493_v6 }
 0x25e   : > { %612 = vmatpush.msrb.mxu2 %v577_v12 }
 0x25f   : > { %v562_v32 = vpop.permute.xlu1 %561 }
 0x2ad   : > { %v637_v45 = vpop.permute.xlu1 %636 }
 0x2c0   : > { %v388_v13 = vpop.f32.mrf.mxu2 }
 0x2c1   : > { %v412_v15 = vadd.f32 %v411_v14, %v388_v13 }
 0x2c8   : > { %v391_v20 = vpop.f32.mrf.mxu2 }
 0x2c9   : > { %v415_v24 = vadd.f32 %v414_v21, %v391_v20 }
 0x2d2   : > { %v484_v16 = vpop.f32.mrf.mxu0  ;;  %v548_v17 = vpop.f32.mrf.mxu1 }
 0x2d3   : > { %v490_v18 = vadd.f32 %v484_v16, %v412_v15 }
 0x2d5   : > { %v554_v22 = vadd.f32 %v548_v17, %v490_v18 }
 0x2d7   : > { %v564_v23 = vadd.f32 %v558_v19, %v554_v22 }
 0x2d9   : > { %v566_v28 = vmax.f32 %v564_v23, 0.0 }
 0x2da   : > { %v487_v29 = vpop.f32.mrf.mxu0  ;;  %v551_v30 = vpop.f32.mrf.mxu1 }
 0x2db   : > { %v491_v31 = vadd.f32 %v487_v29, %v415_v24  ;;  %764 = vmatmul.msk.f32.vlgmr.msrb.gmra.mxu2 %vm587_vm6, %v566_v28 }
 0x2dd   : > { %v555_v33 = vadd.f32 %v551_v30, %v491_v31 }
 0x2df   : > { %v565_v34 = vadd.f32 %v562_v32, %v555_v33 }
 0x2e1   : > { %v567_v35 = vmax.f32 %v565_v34, 0.0 }
 0x2e3   : > { %765 = vmatmul.msk.f32.gmra.mxu2 %vm587_vm6, %v567_v35 }
 0x35e   : > { %v614_v36 = vpop.f32.mrf.mxu2 }
 0x366   : > { %v617_v37 = vpop.f32.mrf.mxu2 }
 0x367   : > { %v978_v38 = vpack.i.bf16 %v614_v36, %v617_v37 }
 0x369   : > { %979 = vrot.lane.b32.xlu0 %v978_v38, %s1055_s17  ;;  %974 = vrot.lane.b32.xlu2 %v978_v38, %s1056_s11  ;;  %s1064_s17 = smov 77   ;;  %s161_s11 = sand.u32 1, %s1039_s13  }
 0x36a   : > { %s162_s7 = scalar_lea.vmem [#allocation2], %s161_s11  ;;  %s683_s10 = scalar_lea.sflag [#allocation3], %s161_s11 }
 0x36b   : > { %s693_s8 = sshll.u32 %s162_s7, 4  ;;  %s694_s8 = int_to_ptr.vmem [resolvable:$true] %s693_s8 }
 0x3c3   : > { %v975_v39 = vpop.permute.xlu2 %974 }
 0x3c4   : > { %v976_v40 = vunpack.i.l.bf16 %v975_v39  ;;  %v977_v42 = vunpack.i.h.bf16 %v975_v39 }
 0x3c6   : > { %652 = vmatpush.msrb.mxu3 %v976_v40 }
 0x3c8   : > { %653 = vmatpush.msrb.mxu3 %v977_v42 }
 0x3db   : > { %v980_v43 = vpop.permute.xlu0 %979 }
 0x3dc   : > { %v981_v25 = vunpack.i.l.bf16 %v980_v43  ;;  %v982_v26 = vunpack.i.h.bf16 %v980_v43 }
 0x3de   : > { %654 = vmatpush.msrb.mxu3 %v981_v25 }
 0x3e0   : > { %655 = vmatpush.msrb.mxu3 %v982_v26 }
 0x3e2   : > { %656 = vmatpush.msrb.mxu3 %v617_v37 }
 0x3e4   : > { %657 = vmatpush.msrb.mxu3 %v614_v36 }
 0x3e5   : > { %766 = vmatmul.msk.f32.vlgmr.msrb.gmra.mxu3 %vm639_vm7, %v634_v41 }
 0x468   : > { %v659_v46 = vpop.f32.mrf.mxu3 }
 0x469   : > { %v660_v47 = vadd.f32 %v659_v46, %v637_v45 }
 0x46b   : > { %664 = vperm.xlu2 %983, %v660_v47  }
 0x4c5   : > { %v665_v48 = vpop.permute.xlu2 %664 }
 0x4c6   : > { %v667_v49 = vmul.f32 %v665_v48, %v634_v41 }
 0x4c8   : > { %v669_v50 = vsel %vm668_vm8, %v667_v49, 0.0 }
 0x4c9   : > { %v670_v51 = vrot.slane %v669_v50, 4 }
 0x4cb   : > { %v671_v52 = vadd.f32 %v670_v51, %v669_v50 }
 0x4cd   : > { %v672_v53 = vrot.slane %v671_v52, 2 }
 0x4cf   : > { %v673_v54 = vadd.f32 %v672_v53, %v671_v52 }
 0x4d1   : > { %v674_v55 = vrot.slane %v673_v54, 1 }
 0x4d3   : > { %v675_v8 = vadd.f32 %v674_v55, %v673_v54 }
 0x4d5   : > { %677 = vrot.lane.b32.xlu0 %v675_v8, %s1064_s17 }
 0x547   : > { %v678_v27 = vpop.permute.xlu0 %677 }
 0x548   : > { %681 = vst.msk [vmem:[%s162_s7] sm:$0x1] %vm680_vm9, %v678_v27 }
 0x549   : > { %1012 = shalt.err (!%p1009_p3)
}
 0x54a   : > { %770 = dma.vmem_to_hbm [thread:$0]  (%p1123_p5), %s694_s8, 16, %s696_s9, %s683_s10  }
 0x54b PF: > { %p776_p4 = scmp.ge.s32.totalorder %s1047_s15, 2  ;;  %s707_s28 = sand.u32 1, %s1035_s12  }
 0x54c   : > { %s708_s29 = scalar_lea.sflag [#allocation3], %s707_s28 }
 0x54d   : > { %p773_p7 = pnand %p776_p4, %p1127_p6 }
 0x54f   : > { %p774_p8 = pneg %p773_p7 }
 0x551   : > { %1030 = dma.done.wait (%p774_p8), %s708_s29, 16  }
 0x552   : > { %1032 = vsyncadd (%p774_p8), %s708_s29, 4294967280  ;;  %p13_p9 = scmp.ge.s32.totalorder %s1110_s18, 4   ;;  %s1330_s12 = smov %s1039_s13 }
 0x553   : > { %s1331_s13 = smov %s1043_s14  ;;  %s1332_s14 = smov %s1121_s21 }
 0x554   : > { %s1333_s15 = smov %s1110_s18  ;;  %15 = sbr.rel (!%p13_p9) target bundleno = 3 (0x3), region = 67 }
 0x559   :  { %713 = vsyncpa [#allocation3], 1 }
 0x55a   :  { %715 = vsyncpa [#allocation3 + $0x1], 1 }

</bundles_post_ra>
